<compile_context>
chip_gen: v6e
topology: v6e:2x2x1
jax: 0.10.0
libtpu: 0.0.40
codegen_flags: <defaults>
</compile_context>

<pallas_src>
import jax
import jax.numpy as jnp
from jax.experimental import pallas as pl
from jax.experimental.pallas import tpu as pltpu

LANES = 128
SUBLANES = 8
TM_ALIGN = 32  # LCM of the sublane tiling for f32 (8) / bf16 (16) / int8,bool (32)


def _neigh_mask_kernel(x_ref, m_ref, o_ref):
    # Elementwise masking on the VPU; the (possibly narrow) mask dtype is
    # widened in-register for free. One (tm, cols) block per grid step.
    o_ref[...] = x_ref[...] * m_ref[...].astype(o_ref.dtype)


def _round_up(v, m):
    return ((v + m - 1) // m) * m


def _vmem_budget():
    """Generation-aware (block budget, scoped vmem limit) in bytes."""
    cap = None
    try:
        cap = getattr(pltpu.get_tpu_info(), "vmem_capacity_bytes", None)
    except Exception:
        cap = None
    if not cap:
        cap = 64 * 1024 * 1024                       # conservative: v7x per-TC VMEM
    limit = min((cap * 3) // 4, 64 * 1024 * 1024)    # ~48 MiB on v7x, 64 MiB on v5e/v6e
    budget = (limit * 4) // 5                        # headroom for Mosaic internal scratch
    return int(budget), int(limit)


def _masked_mul_call(x2d, m2d, block_rows, grid, vmem_limit):
    rows, cols = x2d.shape
    x_b = jnp.dtype(x2d.dtype).itemsize
    m_b = jnp.dtype(m2d.dtype).itemsize
    cost = pl.CostEstimate(
        flops=rows * cols,
        transcendentals=0,
        bytes_accessed=rows * cols * (2 * x_b + m_b),
    )
    return pl.pallas_call(
        _neigh_mask_kernel,
        out_shape=jax.ShapeDtypeStruct((rows, cols), x2d.dtype),
        grid_spec=pltpu.PrefetchScalarGridSpec(
            num_scalar_prefetch=0,
            grid=(grid,),
            in_specs=[
                pl.BlockSpec((block_rows, cols), lambda i: (i, 0)),
                pl.BlockSpec((block_rows, cols), lambda i: (i, 0)),
            ],
            out_specs=pl.BlockSpec((block_rows, cols), lambda i: (i, 0)),
        ),
        compiler_params=pltpu.CompilerParams(
            dimension_semantics=("parallel",),   # shards steps across v7x's 2 TCs
            vmem_limit_bytes=vmem_limit,
        ),
        cost_estimate=cost,
    )(x2d, m2d)


@jax.jit
def neigh_masking(x, neig_mask):
    """Forward of neighMasking: elementwise x * neigMask (x's dtype).

    The mask may be float, int8 or bool; broadcastable masks are accepted.
    """
    if neig_mask.shape != x.shape:
        # Match PyTorch broadcasting semantics (rare path; materializes mask).
        neig_mask = jnp.broadcast_to(neig_mask, x.shape)

    orig_shape = x.shape
    total = x.size
    x_b = jnp.dtype(x.dtype).itemsize
    m_b = jnp.dtype(neig_mask.dtype).itemsize
    budget, limit = _vmem_budget()

    if total % LANES == 0:
        # Fast path: lane-dense (M, 128) slab, free reshape (no pad / no slice).
        M = total // LANES
        x2d = x.reshape(M, LANES)
        m2d = neig_mask.reshape(M, LANES)

        per_row = LANES * (2 * x_b + m_b)           # x + out + mask bytes per row
        tm_cap = max(TM_ALIGN, (budget // (2 * per_row)) // TM_ALIGN * TM_ALIGN)

        n_tiles = pl.cdiv(M, tm_cap)
        if M >= 2 * TM_ALIGN:
            # Never collapse to one step: >=2 balanced steps so both v7x cores
            # work and input/output DMA overlaps; keep the step count even.
            n_tiles = _round_up(max(n_tiles, 2), 2)
        tm = _round_up(pl.cdiv(M, n_tiles), TM_ALIGN)
        tm = min(tm, tm_cap, _round_up(M, SUBLANES))
        grid = pl.cdiv(M, tm)                        # last block may overhang (masked)

        out2d = _masked_mul_call(x2d, m2d, tm, grid, limit)
        return out2d.reshape(orig_shape)

    # Awkward totals (not a multiple of 128): keep the original trailing dim as
    # the lane axis so no pad / slice is ever emitted; blocks span full rows and
    # the last row-block may overhang (Pallas masks it).
    if x.ndim >= 2:
        C = x.shape[-1]
        R = total // C
    else:
        C, R = total, 1
    x2d = x.reshape(R, C)
    m2d = neig_mask.reshape(R, C)

    per_row = C * (2 * x_b + m_b)
    cap_rows = max(SUBLANES, (budget // (2 * per_row)) // SUBLANES * SUBLANES)
    if R <= cap_rows:
        tm, grid = R, 1                               # single full-dims block
    else:
        tm = cap_rows if cap_rows < TM_ALIGN else (cap_rows // TM_ALIGN) * TM_ALIGN
        grid = pl.cdiv(R, tm)

    out2d = _masked_mul_call(x2d, m2d, tm, grid, limit)
    return out2d.reshape(orig_shape)


if __name__ == "__main__":
    key = jax.random.PRNGKey(0)
    k_x, k_m, k_x2, k_m2, k_x3, k_m3 = jax.random.split(key, 6)

    # 1) NCHW feature map + float32 {0,1} neighborhood mask (typical usage).
    B, C, H, W = 2, 4, 16, 16
    x = jax.random.normal(k_x, (B, C, H, W), dtype=jnp.float32)
    mask_f32 = (jax.random.uniform(k_m, (B, C, H, W)) > 0.5).astype(jnp.float32)
    out = jax.block_until_ready(neigh_masking(x, mask_f32))
    ref = x * mask_f32
    assert out.shape == x.shape and out.dtype == x.dtype
    assert jnp.array_equal(out, ref)

    # 2) narrow int8 mask streamed in its native dtype (in-kernel widen).
    mask_i8 = mask_f32.astype(jnp.int8)
    out_i8 = jax.block_until_ready(neigh_masking(x, mask_i8))
    assert jnp.array_equal(out_i8, ref)

    # 3) multi-step grid with an overhanging (masked) last block, no padding.
    x3 = jax.random.normal(k_x3, (2, 4, 16, 80), dtype=jnp.float32)
    m3 = (jax.random.uniform(k_m3, (2, 4, 16, 80)) > 0.5).astype(jnp.float32)
    out3 = jax.block_until_ready(neigh_masking(x3, m3))
    assert jnp.array_equal(out3, x3 * m3)

    # 4) awkward shape (total not a multiple of 128): trailing dim becomes the
    #    lane axis, still no wrapper-side pad or output slice.
    x2 = jax.random.normal(k_x2, (2, 3, 15, 17), dtype=jnp.float32)
    m2 = (jax.random.uniform(k_m2, (2, 3, 15, 17)) > 0.5).astype(jnp.float32)
    out2 = jax.block_until_ready(neigh_masking(x2, m2))
    assert jnp.array_equal(out2, x2 * m2)

    print("KERNEL_OK")
</pallas_src>

<mosaic_0001>
module attributes {stable_mosaic.version = 11 : i64} {
  func.func @_neigh_mask_kernel(%arg0: i32, %arg1: memref<16x128xf32, #tpu.memory_space<vmem>>, %arg2: memref<16x128xf32, #tpu.memory_space<vmem>>, %arg3: memref<16x128xf32, #tpu.memory_space<vmem>>) attributes {dimension_semantics = [#tpu.dimension_semantics<parallel>], iteration_bounds = array<i64: 1>, scalar_prefetch = 0 : i64, scratch_operands = 0 : i64, tpu.core_type = #tpu.core_type<tc>, window_params = [{transform_indices = @transform_0, window_bounds = array<i64: 16, 128>}, {transform_indices = @transform_1, window_bounds = array<i64: 16, 128>}, {transform_indices = @transform_2, window_bounds = array<i64: 16, 128>}]} {
    %c0 = arith.constant 0 : index
    %c0_0 = arith.constant 0 : index
    %0 = vector.load %arg1[%c0, %c0_0] : memref<16x128xf32, #tpu.memory_space<vmem>>, vector<16x128xf32>
    %c0_1 = arith.constant 0 : index
    %c0_2 = arith.constant 0 : index
    %1 = vector.load %arg2[%c0_1, %c0_2] : memref<16x128xf32, #tpu.memory_space<vmem>>, vector<16x128xf32>
    %2 = arith.mulf %0, %1 : vector<16x128xf32>
    %c0_3 = arith.constant 0 : index
    %c0_4 = arith.constant 0 : index
    %3 = vector.load %arg3[%c0_3, %c0_4] : memref<16x128xf32, #tpu.memory_space<vmem>>, vector<16x128xf32>
    tpu.vector_store %arg3[%c0_3, %c0_4], %2 {strides = array<i32>} : memref<16x128xf32, #tpu.memory_space<vmem>>, vector<16x128xf32>,
    return
  }
  func.func @transform_0(%arg0: i32) -> (i32, i32) {
    %c0_i32 = arith.constant 0 : i32
    %c0_i32_0 = arith.constant 0 : i32
    return %arg0, %c0_i32 : i32, i32
  }
  func.func @transform_1(%arg0: i32) -> (i32, i32) {
    %c0_i32 = arith.constant 0 : i32
    %c0_i32_0 = arith.constant 0 : i32
    return %arg0, %c0_i32 : i32, i32
  }
  func.func @transform_2(%arg0: i32) -> (i32, i32) {
    %c0_i32 = arith.constant 0 : i32
    %c0_i32_0 = arith.constant 0 : i32
    return %arg0, %c0_i32 : i32, i32
  }
}

</mosaic_0001>

<bundles_post_ra>
// kernel: neigh_masking.1
= control target key start
LH: loop header
LB: loop body
LE: loop exit
PB: predicated region body
PF: predicated region fallthrough
CT: control target
= control target key end

     0   :  { %s56_s0 = inlined_call_operand.vmem [shape: f32[16,128], index: 0, kind: input, shape index: {}]   ;;  %s57_s1 = inlined_call_operand.vmem [shape: f32[16,128], index: 1, kind: input, shape index: {}]   ;;  %s58_s2 = inlined_call_operand.vmem [shape: f32[16,128], index: 2, kind: output, shape index: {}]  }
   0x1   :  { %v11_v0 = vld [vmem:[%s56_s0] sm:$0xff]  ;;  %v12_v2 = vld [vmem:[%s56_s0 + $0x8] sm:$0xff] }
   0x2   :  { %v13_v1 = vld [vmem:[%s57_s1] sm:$0xff]  ;;  %v14_v4 = vld [vmem:[%s57_s1 + $0x8] sm:$0xff] }
   0x3   :  { %v15_v3 = vmul.f32 %v13_v1, %v11_v0  ;;  %v16_v5 = vmul.f32 %v14_v4, %v12_v2 }
   0x5   :  { %17 = vst [vmem:[%s58_s2] sm:$0xff] %v15_v3  ;;  %18 = vst [vmem:[%s58_s2 + $0x8] sm:$0xff] %v16_v5 }

</bundles_post_ra>
